<compile_context>
chip_gen: v7x
topology: tpu7x:2x2x1
jax: 0.10.0
libtpu: 0.0.40
codegen_flags: <defaults>
</compile_context>

<pallas_src>
import jax
import jax.numpy as jnp
from jax.experimental import pallas as pl
from jax.experimental.pallas import tpu as pltpu


def _round_up(x: int, m: int) -> int:
    return ((x + m - 1) // m) * m


def _rating_kernel(h_ref, w_ref, bias_ref, out_ref):
    # Linear: contract w (1, D) with the h tile (bt, D) over D -> (1, bt),
    # lane-dense over the batch.  Gathered per-row embedding biases plus the
    # scalar Linear bias arrive pre-summed as a (1, bt) row.
    lin = jax.lax.dot_general(
        w_ref[...], h_ref[...],
        dimension_numbers=(((1,), (1,)), ((), ())),
        preferred_element_type=jnp.float32,
    )  # (1, bt)
    out_ref[...] = lin + bias_ref[...]


def rating_forward(h, weight, bias, user_id, item_id, b_user, b_item, *, block_b=8192):
    """h: (B, D); weight: (D, 1); bias: (1, 1); user_id/item_id: (B, 1) int;
    b_user: (U+1, 1); b_item: (I+1, 1).  Returns (B, 1) float32."""
    B, D = h.shape

    # Batch tile: lane-aligned; keep >=2 grid steps when B allows it (v7x
    # megacore), otherwise a single tile.  bt=8192 -> ~1 MiB of h per step
    # (4 MiB lane-padded in VMEM, x2 double-buffered = 8 MiB).
    bt = _round_up(block_b, 128)
    bt = min(bt, max(128, _round_up(pl.cdiv(B, 2), 128)))
    n_tiles = pl.cdiv(B, bt)

    h32 = h.astype(jnp.float32)                       # no-op copy when already f32
    w_row = weight.astype(jnp.float32).reshape(1, D)  # tiny, stays VMEM-resident

    # Embedding-bias gather stays in the wrapper (XLA gather): scales to
    # arbitrary table sizes and keeps the kernel purely h-bandwidth bound.
    # NOTE: JAX clamps out-of-range ids here; PyTorch indexing would raise.
    uid = user_id.reshape(-1)
    iid = item_id.reshape(-1)
    bias_row = (
        b_user[uid, 0].astype(jnp.float32)
        + b_item[iid, 0].astype(jnp.float32)
        + jnp.asarray(bias, jnp.float32).reshape(())
    ).reshape(1, B)

    # TODO(synk): if the upstream producer can emit h as (D, B) (transpose
    # fused upstream, not an extra pass), switch the h BlockSpec to
    # (D, bt)/(0, i): drops the in-kernel transpose and the 4x lane-padding
    # of the D=32 tile in VMEM.

    out_row = pl.pallas_call(
        _rating_kernel,
        out_shape=jax.ShapeDtypeStruct((1, B), jnp.float32),
        grid=(n_tiles,),
        in_specs=[
            pl.BlockSpec((bt, D), lambda i: (i, 0)),   # h: tiled over batch
            pl.BlockSpec((1, D), lambda i: (0, 0)),    # weight row: resident
            pl.BlockSpec((1, bt), lambda i: (0, i)),   # pre-summed biases (lane-major)
        ],
        out_specs=pl.BlockSpec((1, bt), lambda i: (0, i)),  # lane-dense output row
        compiler_params=pltpu.CompilerParams(
            dimension_semantics=("parallel",),
            vmem_limit_bytes=32 * 1024 * 1024,
        ),
    )(h32, w_row, bias_row)

    return out_row[0, :].reshape(B, 1)


def rating_reference(h, weight, bias, user_id, item_id, b_user, b_item):
    lin = h @ weight + jnp.asarray(bias, jnp.float32).reshape(1, 1)
    bu = b_user[user_id[:, 0]]
    bi = b_item[item_id[:, 0]]
    return lin + bu + bi


if __name__ == "__main__":
    embedding_dim = 32
    user_num = 10
    item_num = 20
    batch = 8

    key = jax.random.PRNGKey(0)
    k_h, k_w, k_b, k_bu, k_bi, k_uid, k_iid = jax.random.split(key, 7)

    # Deterministic synthetic parameters (torch-like init ranges).
    bound = 1.0 / jnp.sqrt(embedding_dim)
    weight = jax.random.uniform(k_w, (embedding_dim, 1), jnp.float32, -bound, bound)
    bias = jax.random.uniform(k_b, (1, 1), jnp.float32, -bound, bound)
    b_user = jax.random.normal(k_bu, (user_num + 1, 1), jnp.float32)
    b_item = jax.random.normal(k_bi, (item_num + 1, 1), jnp.float32)

    # Inputs.
    h = jax.random.normal(k_h, (batch, embedding_dim), jnp.float32)
    user_id = jax.random.randint(k_uid, (batch, 1), 0, user_num + 1, jnp.int32)
    item_id = jax.random.randint(k_iid, (batch, 1), 0, item_num + 1, jnp.int32)

    out = rating_forward(h, weight, bias, user_id, item_id, b_user, b_item)
    out = jax.block_until_ready(out)

    ref = rating_reference(h, weight, bias, user_id, item_id, b_user, b_item)
    assert out.shape == (batch, 1)
    assert jnp.allclose(out, ref, atol=1e-5, rtol=1e-5), (out, ref)

    print("KERNEL_OK")
</pallas_src>

<mosaic_0001>
module attributes {stable_mosaic.version = 11 : i64} {
  func.func @_rating_kernel(%arg0: i32, %arg1: memref<128x32xf32, #tpu.memory_space<vmem>>, %arg2: memref<1x32xf32, #tpu.memory_space<vmem>>, %arg3: memref<1x128xf32, #tpu.memory_space<vmem>>, %arg4: memref<1x128xf32, #tpu.memory_space<vmem>>) attributes {dimension_semantics = [#tpu.dimension_semantics<parallel>], iteration_bounds = array<i64: 1>, scalar_prefetch = 0 : i64, scratch_operands = 0 : i64, tpu.core_type = #tpu.core_type<tc>, window_params = [{transform_indices = @transform_0, window_bounds = array<i64: 128, 32>}, {pipeline_mode = #tpu.pipeline_mode<synchronous>, transform_indices = @transform_1, window_bounds = array<i64: 1, 32>}, {transform_indices = @transform_2, window_bounds = array<i64: 1, 128>}, {transform_indices = @transform_3, window_bounds = array<i64: 1, 128>}]} {
    %c0 = arith.constant 0 : index
    %c0_0 = arith.constant 0 : index
    %0 = vector.load %arg2[%c0, %c0_0] : memref<1x32xf32, #tpu.memory_space<vmem>>, vector<1x32xf32>
    %c0_1 = arith.constant 0 : index
    %c0_2 = arith.constant 0 : index
    %1 = vector.load %arg1[%c0_1, %c0_2] : memref<128x32xf32, #tpu.memory_space<vmem>>, vector<128x32xf32>
    %cst = arith.constant dense<0.000000e+00> : vector<1x128xf32>
    %2 = tpu.matmul %0, %1, %cst {dimension_numbers = #tpu.dot_dimension_numbers<[1], [1], [0], [0], [0, 0, 1, 0], [], []>} : vector<1x32xf32>, vector<128x32xf32>, vector<1x128xf32> -> vector<1x128xf32>
    %c0_3 = arith.constant 0 : index
    %c0_4 = arith.constant 0 : index
    %3 = vector.load %arg3[%c0_3, %c0_4] : memref<1x128xf32, #tpu.memory_space<vmem>>, vector<1x128xf32>
    %4 = arith.addf %2, %3 : vector<1x128xf32>
    %c0_5 = arith.constant 0 : index
    %c0_6 = arith.constant 0 : index
    %5 = vector.load %arg4[%c0_5, %c0_6] : memref<1x128xf32, #tpu.memory_space<vmem>>, vector<1x128xf32>
    tpu.vector_store %arg4[%c0_5, %c0_6], %4 {strides = array<i32>} : memref<1x128xf32, #tpu.memory_space<vmem>>, vector<1x128xf32>,
    return
  }
  func.func @transform_0(%arg0: i32) -> (i32, i32) {
    %c0_i32 = arith.constant 0 : i32
    %c0_i32_0 = arith.constant 0 : i32
    return %arg0, %c0_i32 : i32, i32
  }
  func.func @transform_1(%arg0: i32) -> (i32, i32) {
    %c0_i32 = arith.constant 0 : i32
    %c0_i32_0 = arith.constant 0 : i32
    %c0_i32_1 = arith.constant 0 : i32
    return %c0_i32, %c0_i32_0 : i32, i32
  }
  func.func @transform_2(%arg0: i32) -> (i32, i32) {
    %c0_i32 = arith.constant 0 : i32
    %c0_i32_0 = arith.constant 0 : i32
    return %c0_i32, %arg0 : i32, i32
  }
  func.func @transform_3(%arg0: i32) -> (i32, i32) {
    %c0_i32 = arith.constant 0 : i32
    %c0_i32_0 = arith.constant 0 : i32
    return %c0_i32, %arg0 : i32, i32
  }
}

</mosaic_0001>

<bundles_post_ra>
// kernel: tpu_custom_call.1
= control target key start
LH: loop header
LB: loop body
LE: loop exit
PB: predicated region body
PF: predicated region fallthrough
CT: control target
= control target key end

     0   :  { %8 = vsyncpa [#allocation3], 0  ;;  %s421_s0 = inlined_call_operand.hbm [shape: f32[8,32], index: 0, kind: input, shape index: {}]   ;;  %s422_s1 = inlined_call_operand.vmem [shape: f32[1,32], index: 1, kind: input, shape index: {}]   ;;  %s423_s2 = inlined_call_operand.vmem [shape: f32[1,8], index: 2, kind: input, shape index: {}]   ;;  %s424_s3 = inlined_call_operand.hbm [shape: f32[1,8], index: 3, kind: output, shape index: {}]  }
   0x1   :  { %9 = vsyncpa [#allocation4], 0 }
   0x2   :  { %14 = vsyncadd [#allocation3], 1920  ;;  %s341_s12 = smov [#allocation2]   ;;  %s293_s16 = scalar_lea.hbm %s421_s0, 128 }
   0x3   :  { %s15_s13 = sshll.u32 %s341_s12, 4  ;;  %p294_p0 = scmp.ne.s32.totalorder %s421_s0, %s293_s16  ;;  %s16_s13 = int_to_ptr.vmem [resolvable:$true] %s15_s13 }
   0x4   :  { %p297_p1 = scmp.lt.u32.totalorder %s293_s16, %s421_s0 }
   0x6   :  { %p299_p2 = pnand %p297_p1, %p294_p0 }
   0x8   :  { %302 = shalt.err (!%p299_p2)
}
   0x9   :  { %s303_s21 = scalar_lea.vmem %s16_s13, 128  ;;  %s307_s22 = scalar_lea.vmem %s16_s13, 2048 }
   0xa   :  { %p304_p3 = scmp.ne.s32.totalorder %s16_s13, %s303_s21  ;;  %p308_p4 = scmp.lt.s32.totalorder %s16_s13, %s16_s13 }
   0xb   :  { %p309_p5 = scmp.lt.s32.totalorder %s307_s22, %s303_s21 }
   0xd   :  { %p310_p6 = por %p309_p5, %p308_p4 }
   0xf   :  { %p311_p7 = pnand %p310_p6, %p304_p3 }
  0x11   :  { %314 = shalt.err (!%p311_p7)
}
  0x12   :  { %s342_s23 = smov 128   ;;  %s343_s24 = smov 8  }
  0x13   :  { %21 = dma.hbm_to_vmem [thread:$0]  %s421_s0, 128, %s16_s13, [#allocation3], %s342_s23, %s342_s23, %s343_s24  }
  0x14   :  { %337 = dma.done.wait [#allocation3], 2048  }
  0x15   :  { %338 = vsyncadd [#allocation3], 4294965248  ;;  %v344_v0 = vmov 0.0|0.0   ;;  %vm345_vm0 = vmmov 0   ;;  %v346_v1 = vmov 0.0   ;;  %vm47_vm1 = vcmask 261120  }
  0x16   :  { %254 = vmatprep.subr.bf16.mxu0 %v344_v0  ;;  %251 = vmatprep.mubr.msk.f32.mxu0 %vm345_vm0, %v346_v1  ;;  %v30_v2 = vld [vmem:[#allocation2] sm:$0xff]  ;;  %v31_v3 = vld [vmem:[#allocation2 + $0x8] sm:$0xff]  ;;  %vm382_vm2 = vmpackc.low %vm47_vm1, %vm47_vm1  ;;  %s347_s30 = smov [#allocation5]  }
  0x17   :  { %v255_v5 = vpack.c.bf16 %v31_v3, %v30_v2  ;;  %v32_v6 = vld [vmem:[#allocation2 + $0x10] sm:$0xff]  ;;  %v33_v7 = vld [vmem:[#allocation2 + $0x18] sm:$0xff]  ;;  %v34_v9 = vld [vmem:[#allocation2 + $0x20] sm:$0xff]  ;;  %s176_s4 = sshll.u32 %s347_s30, 4  ;;  %s177_s4 = int_to_ptr.vmem [resolvable:$true] %s176_s4 }
  0x18   :  { %v259_v8 = vpack.c.bf16 %v33_v7, %v32_v6  ;;  %v35_v10 = vld [vmem:[#allocation2 + $0x28] sm:$0xff]  ;;  %v36_v12 = vld [vmem:[#allocation2 + $0x30] sm:$0xff]  ;;  %v37_v13 = vld [vmem:[#allocation2 + $0x38] sm:$0xff]  ;;  %s315_s5 = scalar_lea.vmem %s177_s4, 16  ;;  %s319_s6 = scalar_lea.vmem %s177_s4, 32 }
  0x19   :  { %257 = vmatpush3.bf16.xpose.msk.msra.mxu0 %vm382_vm2, %v255_v5  ;;  %v263_v11 = vpack.c.bf16 %v35_v10, %v34_v9  ;;  %v267_v14 = vpack.c.bf16 %v37_v13, %v36_v12  ;;  %v38_v15 = vld [vmem:[#allocation2 + $0x40] sm:$0xff]  ;;  %v39_v16 = vld [vmem:[#allocation2 + $0x48] sm:$0xff]  ;;  %v40_v18 = vld [vmem:[#allocation2 + $0x50] sm:$0xff]  ;;  %p316_p8 = scmp.ne.s32.totalorder %s177_s4, %s315_s5  ;;  %p320_p9 = scmp.lt.s32.totalorder %s177_s4, %s177_s4 }
  0x1a   :  { %258 = vmatprep.subr.bf16.mxu0 %v344_v0  ;;  %v271_v17 = vpack.c.bf16 %v39_v16, %v38_v15  ;;  %v41_v19 = vld [vmem:[#allocation2 + $0x58] sm:$0xff]  ;;  %v42_v21 = vld [vmem:[#allocation2 + $0x60] sm:$0xff]  ;;  %v43_v22 = vld [vmem:[#allocation2 + $0x68] sm:$0xff]  ;;  %p321_p10 = scmp.lt.s32.totalorder %s319_s6, %s315_s5 }
  0x1b   :  { %v275_v20 = vpack.c.bf16 %v41_v19, %v40_v18  ;;  %v279_v23 = vpack.c.bf16 %v43_v22, %v42_v21  ;;  %v44_v24 = vld [vmem:[#allocation2 + $0x70] sm:$0xff]  ;;  %v45_v25 = vld [vmem:[#allocation2 + $0x78] sm:$0xff]  ;;  %v29_v27 = vld [vmem:[%s422_s1] sm:$0x1] }
  0x1c   :  { %v283_v26 = vpack.c.bf16 %v45_v25, %v44_v24  ;;  %v46_v28 = vld [vmem:[%s423_s2] sm:$0x1]  ;;  %p322_p11 = por %p321_p10, %p320_p9 }
  0x1e   :  { %p323_p12 = pnand %p322_p11, %p316_p8 }
  0x21   :  { %261 = vmatpush3.bf16.xpose.msk.msra.mxu0 %vm382_vm2, %v259_v8 }
  0x22   :  { %262 = vmatprep.subr.bf16.mxu0 %v344_v0 }
  0x29   :  { %265 = vmatpush3.bf16.xpose.msk.msra.mxu0 %vm382_vm2, %v263_v11 }
  0x2a   :  { %266 = vmatprep.subr.bf16.mxu0 %v344_v0 }
  0x31   :  { %269 = vmatpush3.bf16.xpose.msk.msra.mxu0 %vm382_vm2, %v267_v14 }
  0x32   :  { %270 = vmatprep.subr.bf16.mxu0 %v344_v0 }
  0x39   :  { %273 = vmatpush3.bf16.xpose.msk.msra.mxu0 %vm382_vm2, %v271_v17 }
  0x3a   :  { %274 = vmatprep.subr.bf16.mxu0 %v344_v0 }
  0x41   :  { %277 = vmatpush3.bf16.xpose.msk.msra.mxu0 %vm382_vm2, %v275_v20 }
  0x42   :  { %278 = vmatprep.subr.bf16.mxu0 %v344_v0 }
  0x49   :  { %281 = vmatpush3.bf16.xpose.msk.msra.mxu0 %vm382_vm2, %v279_v23 }
  0x4a   :  { %282 = vmatprep.subr.bf16.mxu0 %v344_v0 }
  0x51   :  { %285 = vmatpush3.bf16.xpose.msk.msra.mxu0 %vm382_vm2, %v283_v26 }
  0x58   :  { %252 = vmatmul.mubr.msk.f32.vlgmr.msra.gmra.mrb[0].mxu0 %vm47_vm1, %v29_v27 }
 0x12b   :  { %v165_v29 = vpop.f32.mrb[0].mxu0 }
 0x12c   :  { %v166_v30 = vadd.f32 %v165_v29, %v46_v28  ;;  %v253_v31 = vpop.f32.mrb[1].mxu0 }
 0x12e   :  { %169 = vst [vmem:[#allocation5] sm:$0x1] %v166_v30 }
 0x12f   :  { %326 = shalt.err (!%p323_p12)
}
 0x130   :  { %s327_s8 = scalar_lea.hbm %s424_s3, 16 }
 0x131   :  { %p328_p13 = scmp.ne.s32.totalorder %s424_s3, %s327_s8  ;;  %p331_p0 = scmp.lt.u32.totalorder %s327_s8, %s424_s3 }
 0x133   :  { %p333_p1 = pnand %p331_p0, %p328_p13 }
 0x135   :  { %336 = shalt.err (!%p333_p1)
}
 0x136   :  { %179 = dma.vmem_to_hbm [thread:$0]  %s177_s4, 16, %s424_s3, [#allocation4]  }
 0x137   :  { %339 = dma.done.wait [#allocation4], 16  }
 0x138   :  { %340 = vsyncadd [#allocation4], 4294967280 }
 0x139   :  { %183 = vsyncpa [#allocation3], 1 }
 0x13a   :  { %184 = vsyncpa [#allocation4], 1 }

</bundles_post_ra>
